<compile_context>
chip_gen: v6e
topology: v6e:2x2x1
jax: 0.10.0
libtpu: 0.0.40
codegen_flags: <defaults>
</compile_context>

<pallas_src>
import math
import jax
import jax.numpy as jnp
from jax import lax
from jax.experimental import pallas as pl
from jax.experimental.pallas import tpu as pltpu

# Finite mask value: identical result after max-subtraction (diagonal is always
# kept), and safe for future KV tiling where a tile can be fully masked.
_MASK_VALUE = -1e30


def _attention_kernel(x_ref, w_ref, o_ref):
    # x_ref: (bb, T, C) bf16
    # w_ref: (C, 3C)   bf16  = [Wq.T * C**-0.5 | Wk.T | Wv.T]
    # o_ref: (bb, T, C) out dtype (f32 by default, matching the reference)
    bb, T, C = x_ref.shape
    mxu_dtype = x_ref.dtype

    x = x_ref[...]
    w = w_ref[...]

    # Fused QKV projection: ONE 2-D MXU matmul over all bb*T rows.
    # bf16 operands (pre-cast on the host), f32 accumulation.  The softmax
    # scale is already folded into the Wq columns, so no per-call rescale.
    qkv = jnp.dot(x.reshape(bb * T, C), w,
                  preferred_element_type=jnp.float32)            # (bb*T, 3C) f32
    qkv = qkv.reshape(bb, T, 3 * C)
    # NOTE: at toy C=32 these slices cut inside one 128-lane vreg (cheap lane
    # relayout).  For real configs keep C a multiple of 128 so they are free
    # block selects and the output store is lane-dense.
    q = qkv[:, :, 0 * C:1 * C]
    k = qkv[:, :, 1 * C:2 * C]
    v = qkv[:, :, 2 * C:3 * C]

    # scores[b, i, j] = q[b, i, :] . k[b, j, :]  -- K consumed untransposed,
    # so no (C, T) transpose is ever materialized (no XLU pass).
    scores = jnp.einsum('bqc,bkc->bqk',
                        q.astype(mxu_dtype), k.astype(mxu_dtype),
                        preferred_element_type=jnp.float32)      # (bb, T, T) f32

    # Causal mask from a single 2-D (T, T) iota pair, broadcast over batch.
    row = lax.broadcasted_iota(jnp.int32, (T, T), 0)
    col = lax.broadcasted_iota(jnp.int32, (T, T), 1)
    scores = jnp.where((col <= row)[None, :, :], scores, _MASK_VALUE)

    # Numerically stable softmax: statistics in f32; normalization via the
    # approximate EUP reciprocal (separate issue slot -> nearly free;
    # ~1e-3 relative error, inside the kernel's bf16-operand tolerance).
    m = jnp.max(scores, axis=-1, keepdims=True)
    e = jnp.exp(scores - m)
    denom = jnp.sum(e, axis=-1, keepdims=True)
    probs = e * pl.reciprocal(denom, approx=True)                # (bb, T, T) f32

    out = jnp.einsum('bqk,bkc->bqc',
                     probs.astype(mxu_dtype), v.astype(mxu_dtype),
                     preferred_element_type=jnp.float32)         # (bb, T, C) f32
    o_ref[...] = out.astype(o_ref.dtype)


def _num_tensorcores():
    """Best-effort TensorCore-per-chip count (2 on v7x, 1 on v5e/v6e)."""
    try:
        info = pltpu.get_tpu_info()
    except Exception:
        return 1
    for name in ("num_cores", "core_count", "num_tensorcores",
                 "tensorcores_per_chip", "cores_per_chip"):
        n = getattr(info, name, None)
        if isinstance(n, int) and n > 0:
            return n
    return 1


def prepare_qkv_weight(wq, wk, wv, *, compute_dtype=jnp.bfloat16):
    """One-time weight prep (do this once, not per call):
       * transpose torch (out, in) Linear weights,
       * fold the softmax scale C**-0.5 into the Wq columns,
       * fuse into a single (C, 3C) block so the kernel does one MXU matmul,
       * cast to the MXU-native compute dtype (bf16)."""
    C = wq.shape[1]
    scale = C ** -0.5
    w = jnp.concatenate([wq.T * scale, wk.T, wv.T], axis=1)      # (C, 3C) f32
    return w.astype(compute_dtype)


def attention_forward(x, w_qkv, *, batch_block=None, out_dtype=None):
    """x: (B, T, C); w_qkv: (C, 3C) from prepare_qkv_weight (bf16, scale folded).

    batch_block: batch elements per grid step.  Default: B // num_tensorcores
    (so v7x gets a >= 2-step "parallel" axis for both TCs; single step on
    v5e/v6e to avoid per-step pipeline overhead).
    out_dtype: defaults to x.dtype (f32 reference semantics); pass jnp.bfloat16
    if downstream consumers accept it to halve output writeback DMA.
    """
    B, T, C = x.shape
    assert w_qkv.shape == (C, 3 * C)
    out_dtype = x.dtype if out_dtype is None else out_dtype
    compute_dtype = w_qkv.dtype

    # Pre-cast activations to the MXU compute dtype: halves HBM->VMEM DMA bytes
    # and VMEM footprint of the double-buffered input block.
    x_c = x.astype(compute_dtype)

    if batch_block is None:
        ncores = _num_tensorcores()
        bb = B // ncores if (ncores > 1 and B % ncores == 0) else B
    else:
        bb = batch_block
    assert B % bb == 0, "batch_block must divide B"

    # --- VMEM budget: blocks are double-buffered (weight single-buffered when
    # large); f32 temporaries (qkv, scores/exp/probs, out) dominate as T grows.
    in_item = jnp.dtype(compute_dtype).itemsize
    out_item = jnp.dtype(out_dtype).itemsize
    x_blk = bb * T * C * in_item
    w_blk = C * 3 * C * in_item
    o_blk = bb * T * C * out_item
    w_bufs = 1 if w_blk >= (1 << 20) else 2
    tmps = bb * T * 3 * C * 4 + 3 * bb * T * T * 4 + 2 * bb * T * C * 4
    resident = 2 * x_blk + w_bufs * w_blk + 2 * o_blk + tmps
    # Floor at the v6e/v7x scoped default; cap at 128 MiB (v5e/v6e physical).
    # On v7x (64 MiB physical) shrink bb / tile T before hitting the cap.
    vmem_limit = int(min(max(2 * resident, 32 * 1024 * 1024), 128 * 1024 * 1024))

    # Constant-index fused weight block.  Once it is big enough to matter,
    # single-buffer it (it never changes across grid steps) to halve its VMEM.
    w_index_map = lambda b: (0, 0)
    if w_bufs == 1:
        try:
            w_spec = pl.BlockSpec((C, 3 * C), w_index_map,
                                  pipeline_mode=pl.Buffered(1))
        except TypeError:  # older BlockSpec without pipeline_mode kwarg
            w_spec = pl.BlockSpec((C, 3 * C), w_index_map)
    else:
        w_spec = pl.BlockSpec((C, 3 * C), w_index_map)

    return pl.pallas_call(
        _attention_kernel,
        out_shape=jax.ShapeDtypeStruct((B, T, C), out_dtype),
        grid_spec=pltpu.PrefetchScalarGridSpec(
            num_scalar_prefetch=0,
            grid=(B // bb,),
            in_specs=[
                pl.BlockSpec((bb, T, C), lambda b: (b, 0, 0)),
                w_spec,
            ],
            out_specs=pl.BlockSpec((bb, T, C), lambda b: (b, 0, 0)),
        ),
        compiler_params=pltpu.CompilerParams(
            dimension_semantics=("parallel",),
            vmem_limit_bytes=vmem_limit,
        ),
    )(x_c, w_qkv)


def reference_forward(x, wq_t, wk_t, wv_t):
    """Pure-JAX f32 reference mirroring the PyTorch forward (eval mode)."""
    B, T, C = x.shape
    q = x @ wq_t
    k = x @ wk_t
    v = x @ wv_t
    wei = (q @ jnp.swapaxes(k, -2, -1)) * (k.shape[-1] ** -0.5)
    tril = jnp.tril(jnp.ones((T, T), dtype=bool))
    wei = jnp.where(tril, wei, -jnp.inf)
    wei = jax.nn.softmax(wei, axis=-1)
    return wei @ v


if __name__ == "__main__":
    # Small, module-consistent shapes: emb_dim=32, window_size=8, n_heads=4
    # (n_heads noted for parity with ModelArgs; the forward never splits heads).
    B, T, C = 2, 8, 32

    key = jax.random.PRNGKey(0)
    kx, kq, kk, kv, ko = jax.random.split(key, 5)

    x = jax.random.normal(kx, (B, T, C), dtype=jnp.float32)

    # nn.Linear(emb_dim, emb_dim, bias=False) weights, (out, in) layout,
    # uniform init with bound 1/sqrt(fan_in) like torch.
    bound = 1.0 / math.sqrt(C)
    wq = jax.random.uniform(kq, (C, C), jnp.float32, -bound, bound)
    wk = jax.random.uniform(kk, (C, C), jnp.float32, -bound, bound)
    wv = jax.random.uniform(kv, (C, C), jnp.float32, -bound, bound)
    wo = jax.random.uniform(ko, (C, C), jnp.float32, -bound, bound)  # unused (as in torch forward)

    # One-time weight prep: transpose + scale-fold + fuse + bf16 cast.
    w_qkv = prepare_qkv_weight(wq, wk, wv)                        # (C, 3C) bf16

    out = attention_forward(x, w_qkv)
    out = jax.block_until_ready(out)

    ref = reference_forward(x, wq.T, wk.T, wv.T)
    assert out.shape == (B, T, C)
    # Tolerance widened vs. the pure-f32 reference: bf16 MXU operands
    # (f32 accumulation + f32 softmax stats) + approx EUP reciprocal.
    assert jnp.allclose(out.astype(jnp.float32), ref, atol=5e-2, rtol=5e-2), \
        "mismatch vs reference"

    print("KERNEL_OK")
</pallas_src>

<mosaic_0001>
module attributes {stable_mosaic.version = 11 : i64} {
  func.func @_attention_kernel(%arg0: i32, %arg1: memref<2x8x32xbf16, #tpu.memory_space<vmem>>, %arg2: memref<32x96xbf16, #tpu.memory_space<vmem>>, %arg3: memref<2x8x32xf32, #tpu.memory_space<vmem>>) attributes {dimension_semantics = [#tpu.dimension_semantics<parallel>], iteration_bounds = array<i64: 1>, scalar_prefetch = 0 : i64, scratch_operands = 0 : i64, tpu.core_type = #tpu.core_type<tc>, window_params = [{transform_indices = @transform_0, window_bounds = array<i64: 2, 8, 32>}, {pipeline_mode = #tpu.pipeline_mode<synchronous>, transform_indices = @transform_1, window_bounds = array<i64: 32, 96>}, {transform_indices = @transform_2, window_bounds = array<i64: 2, 8, 32>}]} {
    %c0 = arith.constant 0 : index
    %c0_0 = arith.constant 0 : index
    %c0_1 = arith.constant 0 : index
    %0 = vector.load %arg1[%c0, %c0_0, %c0_1] : memref<2x8x32xbf16, #tpu.memory_space<vmem>>, vector<2x8x32xbf16>
    %c0_2 = arith.constant 0 : index
    %c0_3 = arith.constant 0 : index
    %1 = vector.load %arg2[%c0_2, %c0_3] : memref<32x96xbf16, #tpu.memory_space<vmem>>, vector<32x96xbf16>
    %2 = vector.shape_cast %0 : vector<2x8x32xbf16> to vector<16x32xbf16>
    %cst = arith.constant dense<0.000000e+00> : vector<16x96xf32>
    %3 = tpu.matmul %2, %1, %cst {dimension_numbers = #tpu.dot_dimension_numbers<[1], [0], [0], [1], [0, 0, 1, 1], [], []>} : vector<16x32xbf16>, vector<32x96xbf16>, vector<16x96xf32> -> vector<16x96xf32>
    %4 = vector.shape_cast %3 : vector<16x96xf32> to vector<2x8x96xf32>
    %5 = vector.extract_strided_slice %4 {offsets = [0, 0, 0], sizes = [2, 8, 32], strides = [1, 1, 1]} : vector<2x8x96xf32> to vector<2x8x32xf32>
    %6 = vector.extract_strided_slice %4 {offsets = [0, 0, 32], sizes = [2, 8, 32], strides = [1, 1, 1]} : vector<2x8x96xf32> to vector<2x8x32xf32>
    %7 = vector.extract_strided_slice %4 {offsets = [0, 0, 64], sizes = [2, 8, 32], strides = [1, 1, 1]} : vector<2x8x96xf32> to vector<2x8x32xf32>
    %8 = arith.truncf %5 : vector<2x8x32xf32> to vector<2x8x32xbf16>
    %9 = arith.truncf %6 : vector<2x8x32xf32> to vector<2x8x32xbf16>
    "tpu.trace_start"() <{level = 10 : i32, message = "bqc,bkc->bqk"}> : () -> ()
    %cst_4 = arith.constant dense<0.000000e+00> : vector<2x8x8xf32>
    %10 = tpu.matmul %8, %9, %cst_4 {dimension_numbers = #tpu.dot_dimension_numbers<[2], [2], [1], [1], [0, 0, 0, 1, 1, 1], [0], [0]>} : vector<2x8x32xbf16>, vector<2x8x32xbf16>, vector<2x8x8xf32> -> vector<2x8x8xf32>
    "tpu.trace_stop"() : () -> ()
    %11 = tpu.iota {dimensions = array<i32: 0>} : vector<8x8xi32>
    %12 = tpu.iota {dimensions = array<i32: 1>} : vector<8x8xi32>
    %13 = arith.cmpi sle, %12, %11 : vector<8x8xi32>
    %14 = vector.shape_cast %13 : vector<8x8xi1> to vector<1x8x8xi1>
    %cst_5 = arith.constant -1.000000e+30 : f32
    %15 = vector.shape_cast %14 : vector<1x8x8xi1> to vector<1x8x8xi1>
    %16 = vector.broadcast %15 : vector<1x8x8xi1> to vector<2x8x8xi1>
    %17 = vector.broadcast %cst_5 : f32 to vector<2x8x8xf32>
    %18 = arith.select %16, %10, %17 : vector<2x8x8xi1>, vector<2x8x8xf32>
    %cst_6 = arith.constant dense<0xFF800000> : vector<2x8xf32>
    %19 = vector.multi_reduction <maximumf>, %18, %cst_6 [2] : vector<2x8x8xf32> to vector<2x8xf32>
    %20 = vector.shape_cast %19 : vector<2x8xf32> to vector<2x8x1xf32>
    %21 = vector.broadcast %20 : vector<2x8x1xf32> to vector<2x8x8xf32>
    %22 = arith.subf %18, %21 : vector<2x8x8xf32>
    %23 = math.exp %22 : vector<2x8x8xf32>
    %cst_7 = arith.constant dense<0.000000e+00> : vector<2x8xf32>
    %24 = vector.multi_reduction <add>, %23, %cst_7 [2] : vector<2x8x8xf32> to vector<2x8xf32>
    %25 = vector.shape_cast %24 : vector<2x8xf32> to vector<2x8x1xf32>
    %26 = tpu.reciprocal %25 {approx = true} : vector<2x8x1xf32> -> vector<2x8x1xf32>
    %27 = vector.broadcast %26 : vector<2x8x1xf32> to vector<2x8x8xf32>
    %28 = arith.mulf %23, %27 : vector<2x8x8xf32>
    %29 = arith.truncf %28 : vector<2x8x8xf32> to vector<2x8x8xbf16>
    %30 = arith.truncf %7 : vector<2x8x32xf32> to vector<2x8x32xbf16>
    "tpu.trace_start"() <{level = 10 : i32, message = "bqk,bkc->bqc"}> : () -> ()
    %cst_8 = arith.constant dense<0.000000e+00> : vector<2x8x32xf32>
    %31 = tpu.matmul %29, %30, %cst_8 {dimension_numbers = #tpu.dot_dimension_numbers<[2], [1], [1], [2], [0, 0, 0, 1, 1, 2], [0], [0]>} : vector<2x8x8xbf16>, vector<2x8x32xbf16>, vector<2x8x32xf32> -> vector<2x8x32xf32>
    "tpu.trace_stop"() : () -> ()
    %c0_9 = arith.constant 0 : index
    %c0_10 = arith.constant 0 : index
    %c0_11 = arith.constant 0 : index
    %32 = vector.load %arg3[%c0_9, %c0_10, %c0_11] : memref<2x8x32xf32, #tpu.memory_space<vmem>>, vector<2x8x32xf32>
    tpu.vector_store %arg3[%c0_9, %c0_10, %c0_11], %31 {strides = array<i32>} : memref<2x8x32xf32, #tpu.memory_space<vmem>>, vector<2x8x32xf32>,
    return
  }
  func.func @transform_0(%arg0: i32) -> (i32, i32, i32) {
    %c0_i32 = arith.constant 0 : i32
    %c0_i32_0 = arith.constant 0 : i32
    %c0_i32_1 = arith.constant 0 : i32
    return %arg0, %c0_i32, %c0_i32_0 : i32, i32, i32
  }
  func.func @transform_1(%arg0: i32) -> (i32, i32) {
    %c0_i32 = arith.constant 0 : i32
    %c0_i32_0 = arith.constant 0 : i32
    %c0_i32_1 = arith.constant 0 : i32
    return %c0_i32, %c0_i32_0 : i32, i32
  }
  func.func @transform_2(%arg0: i32) -> (i32, i32, i32) {
    %c0_i32 = arith.constant 0 : i32
    %c0_i32_0 = arith.constant 0 : i32
    %c0_i32_1 = arith.constant 0 : i32
    return %arg0, %c0_i32, %c0_i32_0 : i32, i32, i32
  }
}

</mosaic_0001>

<bundles_post_ra>
// kernel: tpu_custom_call.1
= control target key start
LH: loop header
LB: loop body
LE: loop exit
PB: predicated region body
PF: predicated region fallthrough
CT: control target
= control target key end

     0   :  { %7 = vsyncpa [#allocation3], 0  ;;  %s558_s0 = inlined_call_operand.hbm [shape: bf16[2,8,32], index: 0, kind: input, shape index: {}]   ;;  %s559_s1 = inlined_call_operand.hbm [shape: bf16[32,96], index: 1, kind: input, shape index: {}]   ;;  %s560_s2 = inlined_call_operand.hbm [shape: f32[2,8,32], index: 2, kind: output, shape index: {}]  }
   0x1   :  { %8 = vsyncpa [#allocation6], 0 }
   0x2   :  { %9 = vsyncpa [#allocation4], 0  ;;  %s498_s9 = smov [#allocation2]  }
   0x3   :  { %s15_s10 = sshll.u32 %s498_s9, 4  ;;  %s16_s10 = int_to_ptr.vmem [resolvable:$true] %s15_s10 }
   0x4   :  { %s440_s11 = scalar_lea.vmem %s16_s10, 128  ;;  %p445_p1 = scmp.lt.s32.totalorder %s16_s10, %s16_s10 }
   0x5   :  { %p441_p0 = scmp.ne.s32.totalorder %s16_s10, %s440_s11  ;;  %p446_p2 = scmp.lt.s32.totalorder %s440_s11, %s440_s11 }
   0x7   :  { %p447_p3 = por %p446_p2, %p445_p1 }
   0x9   :  { %p448_p4 = pnand %p447_p3, %p441_p0 }
   0xb   :  { %451 = shalt.err (!%p448_p4)
}
   0xc   :  { %s499_s12 = smov 64   ;;  %s500_s13 = smov 4  }
   0xd   :  { %21 = dma.hbm_to_vmem [thread:$0]  %s558_s0, 128, %s16_s10, [#allocation3], %s499_s12, %s499_s12, %s500_s13  }
   0xe   :  { %s501_s16 = smov [#allocation5]  }
   0xf   :  { %s27_s17 = sshll.u32 %s501_s16, 4  ;;  %s28_s17 = int_to_ptr.vmem [resolvable:$true] %s27_s17 }
  0x10   :  { %s460_s18 = scalar_lea.vmem %s28_s17, 256  ;;  %p465_p6 = scmp.lt.s32.totalorder %s28_s17, %s28_s17 }
  0x11   :  { %p461_p5 = scmp.ne.s32.totalorder %s28_s17, %s460_s18  ;;  %p466_p7 = scmp.lt.s32.totalorder %s460_s18, %s460_s18 }
  0x13   :  { %p467_p8 = por %p466_p7, %p465_p6 }
  0x15   :  { %p468_p9 = pnand %p467_p8, %p461_p5 }
  0x17   :  { %471 = shalt.err (!%p468_p9)
}
  0x18   :  { %33 = dma.hbm_to_vmem [thread:$0]  %s559_s1, 256, %s28_s17, [#allocation6], %s499_s12, %s499_s12, %s500_s13  }
  0x19   :  { %492 = dma.done.wait [#allocation3], 128  }
  0x1a   :  { %493 = vsyncadd [#allocation3], 4294967168 }
  0x1b   :  { %494 = dma.done.wait [#allocation6], 256  }
  0x1c   :  { %495 = vsyncadd [#allocation6], 4294967040  ;;  %v502_v0 = vmov 0.0   ;;  %vm503_vm0 = vmmov 0   ;;  %v421_v1 = vld [vmem:[#allocation5 + $0x8] sm:$0xff]   ;;  %v422_v2 = vld [vmem:[#allocation5] sm:$0xff]   ;;  %v209_v14 = vlaneseq }
  0x1d   :  { %379 = vmatprep.subr.bf16.mxu0 %v502_v0  ;;  %383 = vmatprep.mubr.msk.bf16.mxu0 %vm503_vm0, %v502_v0  ;;  %v423_v3 = vld [vmem:[#allocation2] sm:$0xff]   ;;  %vm64_vm1 = vcmask 261120   ;;  %s504_s0 = smov 96   ;;  %vm218_vm3 = vcmask 64512   ;;  %vm248_vm4 = vcmask 1043456   ;;  %s505_s1 = smov [#allocation7]  }
  0x1e   :  { %387 = vmatprep.subr.bf16.mxu1 %v502_v0  ;;  %389 = vmatprep.mubr.msk.bf16.mxu1 %vm503_vm0, %v502_v0  ;;  %v210_v15 = vshrl.u32 %v209_v14, 7  ;;  %v212_v16 = vand.u32 127, %v209_v14  ;;  %s347_s21 = sshll.u32 %s505_s1, 4  ;;  %s348_s21 = int_to_ptr.vmem [resolvable:$true] %s347_s21 }
  0x1f   :  { %380 = vmatpush3.bf16.msra.mxu0 %v421_v1  ;;  %s472_s22 = scalar_lea.vmem %s348_s21, 256  ;;  %p477_p11 = scmp.lt.s32.totalorder %s348_s21, %s348_s21 }
  0x20   :  { %381 = vmatprep.subr.bf16.mxu0 %v502_v0  ;;  %vm213_vm2 = vcmp.le.s32.totalorder %v212_v16, %v210_v15  ;;  %p473_p10 = scmp.ne.s32.totalorder %s348_s21, %s472_s22  ;;  %p478_p12 = scmp.lt.s32.totalorder %s472_s22, %s472_s22 }
  0x22   :  { %p479_p13 = por %p478_p12, %p477_p11 }
  0x23   :  { %382 = vmatpush3.bf16.msra.mxu0 %v422_v2 }
  0x24   :  { %393 = vmatprep.subr.bf16.mxu0 %v502_v0  ;;  %p480_p0 = pnand %p479_p13, %p473_p10 }
  0x26   :  { %384 = vmatmul.mubr.msk.bf16.vlgmr.msra.gmra.mxu0 %vm64_vm1, %v423_v3 }
  0x27   :  { %395 = vmatprep.mubr.msk.bf16.mxu0 %vm503_vm0, %v502_v0 }
  0xe6   :  { %v102_v4 = vpop.f32.mrf.mxu0 }
  0xe7   :  { %v109_v5 = vpack.c.bf16 %v102_v4, %v102_v4 }
  0xe8   :  { %v385_v6 = vpop.f32.mrf.mxu0 }
  0xe9   :  { %112 = vrot.lane.b32.xlu0 %v109_v5, %s504_s0 }
  0xea   :  { %v105_v7 = vpop.f32.mrf.mxu0 }
  0xeb   :  { %v110_v8 = vpack.c.bf16 %v105_v7, %v105_v7 }
  0xec   :  { %v386_v9 = vpop.f32.mrf.mxu0 }
  0xed   :  { %161 = vrot.lane.b32.xlu0 %v110_v8, %s504_s0 }
 0x15b   :  { %v113_v10 = vpop.permute.xlu0 %112 }
 0x15c   :  { %v118_v11 = vsel %vm64_vm1, %v113_v10, 0 }
 0x15d   :  { %388 = vmatpush3.bf16.xpose.msra.mxu1 %v118_v11 }
 0x15e   :  { %399 = vmatprep.subr.bf16.mxu1 %v502_v0 }
 0x15f   :  { %v162_v12 = vpop.permute.xlu0 %161 }
 0x160   :  { %v167_v13 = vsel %vm64_vm1, %v162_v12, 0 }
 0x161   :  { %394 = vmatpush3.bf16.xpose.msra.mxu0 %v167_v13 }
 0x162   :  { %405 = vmatprep.subr.bf16.mxu0 %v502_v0 }
 0x164   :  { %390 = vmatmul.mubr.msk.bf16.vlgmr.msra.gmra.mxu1 %vm64_vm1, %v109_v5 }
 0x165   :  { %401 = vmatprep.mubr.msk.bf16.mxu1 %vm503_vm0, %v502_v0 }
 0x168   :  { %396 = vmatmul.mubr.msk.bf16.vlgmr.msra.gmra.mxu0 %vm64_vm1, %v110_v8 }
 0x169   :  { %407 = vmatprep.mubr.msk.bf16.mxu0 %vm503_vm0, %v502_v0 }
 0x224   :  { %v154_v17 = vpop.f32.mrf.mxu1 }
 0x225   :  { %v216_v18 = vsel %vm213_vm2, %v154_v17, -1e+30 }
 0x226   :  { %v391_v19 = vpop.f32.mrf.mxu1  ;;  %v219_v20 = vsel %vm218_vm3, %v216_v18, -inf }
 0x227   :  { %220 = vmax.xlane.f32.xlu1 %v219_v20 }
 0x228   :  { %v157_v21 = vpop.f32.mrf.mxu1  ;;  %v203_v22 = vpop.f32.mrf.mxu0 }
 0x229   :  { %v217_v23 = vsel %vm213_vm2, %v203_v22, -1e+30 }
 0x22a   :  { %v392_v24 = vpop.f32.mrf.mxu1  ;;  %v397_v25 = vpop.f32.mrf.mxu0  ;;  %v222_v26 = vsel %vm218_vm3, %v217_v23, -inf }
 0x22b   :  { %223 = vmax.xlane.f32.xlu1 %v222_v26 }
 0x22c   :  { %v206_v27 = vpop.f32.mrf.mxu0 }
 0x22e   :  { %v398_v28 = vpop.f32.mrf.mxu0 }
 0x23c   :  { %243 = vrot.lane.b32.xlu1 %v109_v5, %s499_s12 }
 0x2b0   :  { %v221_v29 = vpop.xlane.xlu1 %220 }
 0x2b1   :  { %v225_v30 = vsub.f32 %v216_v18, %v221_v29 }
 0x2b3   :  { %v227_v31 = vmul.f32 1.442695, %v225_v30 }
 0x2b4   :  { %v224_v32 = vpop.xlane.xlu1 %223 }
 0x2b5   :  { %424 = vpow2.f32 %v227_v31  ;;  %v226_v33 = vsub.f32 %v217_v23, %v224_v32 }
 0x2b7   :  { %v229_v34 = vmul.f32 1.442695, %v226_v33 }
 0x2b8   :  { %v244_v35 = vpop.permute.xlu1 %243 }
 0x2b9   :  { %426 = vpow2.f32 %v229_v34  ;;  %v250_v36 = vsel %vm248_vm4, %v244_v35, 0 }
 0x2ba   :  { %400 = vmatpush3.bf16.msra.mxu1 %v250_v36 }
 0x2c2   :  { %v425_v37 = vpop.eup %424 }
 0x2c3   :  { %v231_v38 = vsel %vm218_vm3, %v425_v37, 0.0 }
 0x2c4   :  { %232 = vadd.xlane.f32.xlu0 %v231_v38 }
 0x2c6   :  { %v427_v39 = vpop.eup %426 }
 0x2c7   :  { %v234_v40 = vsel %vm218_vm3, %v427_v39, 0.0 }
 0x2c8   :  { %235 = vadd.xlane.f32.xlu1 %v234_v40 }
 0x2d9   :  { %292 = vrot.lane.b32.xlu1 %v110_v8, %s499_s12 }
 0x34d   :  { %v233_v41 = vpop.xlane.xlu0 %232 }
 0x34e   :  { %428 = vrcp.f32 %v233_v41 }
 0x351   :  { %v236_v42 = vpop.xlane.xlu1 %235 }
 0x352   :  { %430 = vrcp.f32 %v236_v42 }
 0x355   :  { %v293_v43 = vpop.permute.xlu1 %292 }
 0x356   :  { %v298_v44 = vsel %vm248_vm4, %v293_v43, 0 }
 0x357   :  { %406 = vmatpush3.bf16.msra.mxu0 %v298_v44 }
 0x35b   :  { %v429_v45 = vpop.eup %428 }
 0x35c   :  { %v239_v46 = vmul.f32 %v429_v45, %v425_v37 }
 0x35e   :  { %v241_v47 = vpack.c.bf16 %v239_v46, %v239_v46 }
 0x35f   :  { %v431_v48 = vpop.eup %430 }
 0x360   :  { %402 = vmatmul.mubr.msk.bf16.vlgmr.msra.gmra.mxu1 %vm218_vm3, %v241_v47  ;;  %v240_v49 = vmul.f32 %v431_v48, %v427_v39 }
 0x362   :  { %v242_v50 = vpack.c.bf16 %v240_v49, %v240_v49 }
 0x364   :  { %408 = vmatmul.mubr.msk.bf16.vlgmr.msra.gmra.mxu0 %vm218_vm3, %v242_v50 }
 0x420   :  { %v286_v51 = vpop.f32.mrf.mxu1 }
 0x421   :  { %340 = vst.msk [vmem:[#allocation7] sm:$0xff] %vm64_vm1, %v286_v51 }
 0x422   :  { %v403_v52 = vpop.f32.mrf.mxu1 }
 0x424   :  { %v289_v53 = vpop.f32.mrf.mxu1  ;;  %v334_v54 = vpop.f32.mrf.mxu0 }
 0x425   :  { %341 = vst.msk [vmem:[#allocation7 + $0x8] sm:$0xff] %vm64_vm1, %v334_v54 }
 0x426   :  { %v404_v55 = vpop.f32.mrf.mxu1  ;;  %v409_v56 = vpop.f32.mrf.mxu0 }
 0x427   :  { %483 = shalt.err (!%p480_p0)
}
 0x428   :  { %s506_s23 = smov 128   ;;  %s507_s24 = smov 8   ;;  %v337_v57 = vpop.f32.mrf.mxu0 }
 0x429   :  { %353 = dma.vmem_to_hbm [thread:$0]  %s348_s21, 256, %s560_s2, [#allocation4], %s506_s23, %s506_s23, %s507_s24  }
 0x42a   :  { %v410_v58 = vpop.f32.mrf.mxu0 }
 0x42b   :  { %496 = dma.done.wait [#allocation4], 256  }
 0x42c   :  { %497 = vsyncadd [#allocation4], 4294967040 }
 0x42d   :  { %357 = vsyncpa [#allocation3], 1 }
 0x42e   :  { %358 = vsyncpa [#allocation6], 1 }
 0x42f   :  { %359 = vsyncpa [#allocation4], 1 }

</bundles_post_ra>
